<compile_context>
chip_gen: v7x
topology: tpu7x:2x2x1
jax: 0.10.0
libtpu: 0.0.40
codegen_flags: <defaults>
</compile_context>

<pallas_src>
import functools
import math

import jax
import jax.numpy as jnp
from jax.experimental import pallas as pl
from jax.experimental.pallas import tpu as pltpu


def _build_pe_table(d_model: int, max_len: int = 5000) -> jnp.ndarray:
    """Deterministic sinusoidal table, matching the PyTorch __init__ exactly.

    Returns pe with shape [max_len, 1, d_model] (float32).
    """
    position = jnp.arange(0, max_len, dtype=jnp.float32)[:, None]            # [max_len, 1]
    div_term = jnp.exp(
        jnp.arange(0, d_model, 2, dtype=jnp.float32) * (-math.log(10000.0) / d_model)
    )                                                                         # [d_model/2]
    pe = jnp.zeros((max_len, d_model), dtype=jnp.float32)
    pe = pe.at[:, 0::2].set(jnp.sin(position * div_term))
    pe = pe.at[:, 1::2].set(jnp.cos(position * div_term))
    # unsqueeze(0).transpose(0, 1) -> [max_len, 1, d_model]
    return pe[:, None, :]


def _tpu_generation_params():
    """(tensorcores_per_chip, target_block_bytes, vmem_limit_bytes) per TPU gen."""
    vmem_cap = None
    try:
        info = pltpu.get_tpu_info()
        vmem_cap = getattr(info, "vmem_capacity_bytes", None)
    except Exception:
        pass
    kind = ""
    try:
        kind = jax.devices()[0].device_kind.lower()
    except Exception:
        pass

    is_v7 = ("7" in kind) or (vmem_cap is not None and vmem_cap <= (64 << 20))
    if is_v7:
        # 2 TCs/chip, 64 MiB VMEM per TC, ~3.2 TB/s HBM: bigger blocks amortize
        # the ~0.35 us per-grid-step cost; double-buffered x+out+pe at 8 MiB
        # blocks is ~34 MiB, well under the 48 MiB limit (Mosaic keeps scratch).
        return 2, 8 << 20, 48 << 20
    if "v6" in kind:
        # 1 TC, 128 MiB VMEM, ~1.4 TB/s HBM.
        return 1, 8 << 20, 64 << 20
    # v5e (1 TC, 128 MiB VMEM, ~820 GB/s) and conservative default.  The
    # explicit vmem limit matters most on v5e, whose scoped default is 16 MiB.
    return 1, 4 << 20, 48 << 20


def _choose_seq_tile(S: int, row_bytes: int, target_block_bytes: int, num_cores: int) -> int:
    """Largest multiple-of-8 sequence tile within the per-block byte budget.

    On multi-TensorCore chips (v7x) the grid is additionally forced to have at
    least 2 steps per core (when S allows it) so every core gets a steady-state
    double-buffered pipeline instead of a single exposed DMA.  Single-core
    chips (v5e/v6e) never get a forced split.
    """
    if S <= 8:
        return S
    ts = min(S, max(8, target_block_bytes // max(row_bytes, 1)))
    ts = max(8, (ts // 8) * 8)                     # sublane-align
    if num_cores > 1:
        min_steps = 2 * num_cores                  # >= 2 blocks per TensorCore
        if pl.cdiv(S, ts) < min_steps and S >= min_steps * 8:
            ts = max(8, ((S // min_steps) // 8) * 8)
    return ts


def _pos_enc_kernel(x_ref, pe_ref, o_ref, *, batch, d_model):
    # x_ref / o_ref: (ts, B*D) lane-dense tiles; pe_ref: (ts, D) tile.
    pe = pe_ref[...]                               # loaded once, reused per batch column
    if batch == 1:
        o_ref[...] = (x_ref[...] + pe).astype(o_ref.dtype)
    else:
        # Unrolled per-batch add: no (ts, B*D) pe temporary in VMEM and no
        # duplicated VALU/store work.  Offsets b*d_model are static Python
        # ints, so the slices are free views; they are lane-aligned whenever
        # d_model % 128 == 0 (the common transformer case).
        for b in range(batch):
            sl = pl.ds(b * d_model, d_model)
            o_ref[:, sl] = (x_ref[:, sl] + pe).astype(o_ref.dtype)


def positional_encoding(
    x: jnp.ndarray,
    pe: jnp.ndarray,
    *,
    target_block_bytes: int | None = None,
    vmem_limit_bytes: int | None = None,
    promote_like_torch: bool = True,
) -> jnp.ndarray:
    """x: [seq_len, batch, d_model]; pe: [max_len, 1, d_model] (or [max_len, d_model])."""
    S, B, D = x.shape
    pe2d = pe.reshape(pe.shape[0], pe.shape[-1])
    assert pe2d.shape[1] == D, "pe d_model mismatch"
    assert pe2d.shape[0] >= S, "pe table shorter than the sequence"

    num_cores, default_block, default_vmem = _tpu_generation_params()
    if target_block_bytes is None:
        target_block_bytes = default_block
    if vmem_limit_bytes is None:
        vmem_limit_bytes = default_vmem

    # PyTorch adds a float32 buffer, so bf16 x produces f32 out; mirror that by
    # default.  (promote_like_torch=False keeps everything in x.dtype for
    # halved output HBM traffic at the cost of a bf16-rounded result.)
    compute_dtype = jnp.promote_types(x.dtype, jnp.float32) if promote_like_torch else x.dtype
    pe2d = pe2d[:S].astype(compute_dtype)          # single cast/slice in the wrapper

    # Lane-dense slab: seq -> sublanes, (batch*d_model) -> lanes.  Free reshape.
    x2d = x.reshape(S, B * D)

    x_item = jnp.dtype(x.dtype).itemsize
    out_item = jnp.dtype(compute_dtype).itemsize
    row_bytes = B * D * max(x_item, out_item)
    ts = _choose_seq_tile(S, row_bytes, target_block_bytes, num_cores)
    grid = (pl.cdiv(S, ts),)

    cost = pl.CostEstimate(
        flops=S * B * D,
        transcendentals=0,
        bytes_accessed=int(S * B * D * (x_item + out_item) + S * D * out_item),
    )

    out2d = pl.pallas_call(
        functools.partial(_pos_enc_kernel, batch=B, d_model=D),
        out_shape=jax.ShapeDtypeStruct((S, B * D), compute_dtype),
        grid_spec=pltpu.PrefetchScalarGridSpec(
            num_scalar_prefetch=0,
            grid=grid,
            in_specs=[
                pl.BlockSpec((ts, B * D), lambda i: (i, 0)),
                pl.BlockSpec((ts, D), lambda i: (i, 0)),
            ],
            out_specs=pl.BlockSpec((ts, B * D), lambda i: (i, 0)),
        ),
        compiler_params=pltpu.CompilerParams(
            dimension_semantics=("parallel",),
            vmem_limit_bytes=vmem_limit_bytes,
        ),
        cost_estimate=cost,
    )(x2d, pe2d)

    return out2d.reshape(S, B, D)


if __name__ == "__main__":
    seq_len, batch, d_model = 8, 2, 32
    max_len = 64  # small synthetic table (same formula as max_len=5000)

    key = jax.random.PRNGKey(0)
    x = jax.random.normal(key, (seq_len, batch, d_model), dtype=jnp.float32)

    pe = _build_pe_table(d_model, max_len)

    out = jax.block_until_ready(positional_encoding(x, pe))

    # Reference check in plain JAX (same semantics as the PyTorch forward).
    ref = x + pe[:seq_len, :]
    assert out.shape == (seq_len, batch, d_model)
    assert out.dtype == ref.dtype
    assert jnp.allclose(out, ref, atol=1e-6), "mismatch vs reference"

    print("KERNEL_OK")
</pallas_src>

<mosaic_0001>
module attributes {stable_mosaic.version = 11 : i64} {
  func.func @_pos_enc_kernel(%arg0: i32, %arg1: memref<8x64xf32, #tpu.memory_space<vmem>>, %arg2: memref<8x32xf32, #tpu.memory_space<vmem>>, %arg3: memref<8x64xf32, #tpu.memory_space<vmem>>) attributes {dimension_semantics = [#tpu.dimension_semantics<parallel>], iteration_bounds = array<i64: 1>, scalar_prefetch = 0 : i64, scratch_operands = 0 : i64, tpu.core_type = #tpu.core_type<tc>, window_params = [{transform_indices = @transform_0, window_bounds = array<i64: 8, 64>}, {transform_indices = @transform_1, window_bounds = array<i64: 8, 32>}, {transform_indices = @transform_2, window_bounds = array<i64: 8, 64>}]} {
    %c0 = arith.constant 0 : index
    %c0_0 = arith.constant 0 : index
    %0 = vector.load %arg2[%c0, %c0_0] : memref<8x32xf32, #tpu.memory_space<vmem>>, vector<8x32xf32>
    %c0_1 = arith.constant 0 : index
    %c0_2 = arith.constant 0 : index
    %1 = vector.load %arg1[%c0_1, %c0_2] : memref<8x64xf32, #tpu.memory_space<vmem>>, vector<8x32xf32>
    %2 = arith.addf %1, %0 : vector<8x32xf32>
    %c0_3 = arith.constant 0 : index
    %c0_4 = arith.constant 0 : index
    %3 = vector.load %arg3[%c0_3, %c0_4] : memref<8x64xf32, #tpu.memory_space<vmem>>, vector<8x32xf32>
    tpu.vector_store %arg3[%c0_3, %c0_4], %2 {strides = array<i32>} : memref<8x64xf32, #tpu.memory_space<vmem>>, vector<8x32xf32>,
    %c0_5 = arith.constant 0 : index
    %c32 = arith.constant 32 : index
    %4 = vector.load %arg1[%c0_5, %c32] : memref<8x64xf32, #tpu.memory_space<vmem>>, vector<8x32xf32>
    %5 = arith.addf %4, %0 : vector<8x32xf32>
    %c0_6 = arith.constant 0 : index
    %c32_7 = arith.constant 32 : index
    %6 = vector.load %arg3[%c0_6, %c32_7] : memref<8x64xf32, #tpu.memory_space<vmem>>, vector<8x32xf32>
    tpu.vector_store %arg3[%c0_6, %c32_7], %5 {strides = array<i32>} : memref<8x64xf32, #tpu.memory_space<vmem>>, vector<8x32xf32>,
    return
  }
  func.func @transform_0(%arg0: i32) -> (i32, i32) {
    %c0_i32 = arith.constant 0 : i32
    %c0_i32_0 = arith.constant 0 : i32
    return %arg0, %c0_i32 : i32, i32
  }
  func.func @transform_1(%arg0: i32) -> (i32, i32) {
    %c0_i32 = arith.constant 0 : i32
    %c0_i32_0 = arith.constant 0 : i32
    return %arg0, %c0_i32 : i32, i32
  }
  func.func @transform_2(%arg0: i32) -> (i32, i32) {
    %c0_i32 = arith.constant 0 : i32
    %c0_i32_0 = arith.constant 0 : i32
    return %arg0, %c0_i32 : i32, i32
  }
}

</mosaic_0001>

<bundles_post_ra>
// kernel: tpu_custom_call.1
= control target key start
LH: loop header
LB: loop body
LE: loop exit
PB: predicated region body
PF: predicated region fallthrough
CT: control target
= control target key end

     0   :  { %7 = vsyncpa [#allocation3], 0  ;;  %s196_s0 = inlined_call_operand.hbm [shape: f32[8,64], index: 0, kind: input, shape index: {}]   ;;  %s197_s1 = inlined_call_operand.hbm [shape: f32[8,32], index: 1, kind: input, shape index: {}]   ;;  %s198_s2 = inlined_call_operand.hbm [shape: f32[8,64], index: 2, kind: output, shape index: {}]  }
   0x1   :  { %8 = vsyncpa [#allocation6], 0 }
   0x2   :  { %9 = vsyncpa [#allocation4], 0  ;;  %s141_s9 = smov [#allocation2]   ;;  %s142_s11 = smov [#allocation5]  }
   0x3   :  { %s16_s10 = sshll.u32 %s141_s9, 4  ;;  %s26_s12 = sshll.u32 %s142_s11, 4  ;;  %s17_s10 = int_to_ptr.vmem [resolvable:$true] %s16_s10  ;;  %s27_s12 = int_to_ptr.vmem [resolvable:$true] %s26_s12 }
   0x4   :  { %s69_s15 = scalar_lea.hbm %s196_s0, 128 }
   0x5   :  { %p70_p0 = scmp.ne.s32.totalorder %s196_s0, %s69_s15  ;;  %p73_p1 = scmp.lt.u32.totalorder %s69_s15, %s196_s0 }
   0x7   :  { %p75_p2 = pnand %p73_p1, %p70_p0 }
   0x9   :  { %78 = shalt.err (!%p75_p2)
}
   0xa   :  { %s79_s20 = scalar_lea.vmem %s17_s10, 128  ;;  %p84_p4 = scmp.lt.s32.totalorder %s17_s10, %s17_s10 }
   0xb   :  { %p80_p3 = scmp.ne.s32.totalorder %s17_s10, %s79_s20  ;;  %p85_p5 = scmp.lt.s32.totalorder %s79_s20, %s79_s20 }
   0xd   :  { %p86_p6 = por %p85_p5, %p84_p4 }
   0xf   :  { %p87_p7 = pnand %p86_p6, %p80_p3 }
  0x11   :  { %90 = shalt.err (!%p87_p7)
}
  0x12   :  { %19 = dma.hbm_to_vmem [thread:$0]  %s196_s0, 128, %s17_s10, [#allocation3]  }
  0x13   :  { %s91_s25 = scalar_lea.hbm %s197_s1, 128 }
  0x14   :  { %p92_p8 = scmp.ne.s32.totalorder %s197_s1, %s91_s25  ;;  %p95_p9 = scmp.lt.u32.totalorder %s91_s25, %s197_s1 }
  0x16   :  { %p97_p10 = pnand %p95_p9, %p92_p8 }
  0x18   :  { %100 = shalt.err (!%p97_p10)
}
  0x19   :  { %s101_s30 = scalar_lea.vmem %s27_s12, 128  ;;  %p106_p12 = scmp.lt.s32.totalorder %s27_s12, %s27_s12 }
  0x1a   :  { %p102_p11 = scmp.ne.s32.totalorder %s27_s12, %s101_s30  ;;  %p107_p13 = scmp.lt.s32.totalorder %s101_s30, %s101_s30 }
  0x1c   :  { %p108_p0 = por %p107_p13, %p106_p12 }
  0x1e   :  { %p109_p1 = pnand %p108_p0, %p102_p11 }
  0x20   :  { %112 = shalt.err (!%p109_p1)
}
  0x21   :  { %29 = dma.hbm_to_vmem [thread:$0]  %s197_s1, 128, %s27_s12, [#allocation6]  }
  0x22   :  { %135 = dma.done.wait [#allocation3], 128  }
  0x23   :  { %136 = vsyncadd [#allocation3], 4294967168 }
  0x24   :  { %137 = dma.done.wait [#allocation6], 128  }
  0x25   :  { %138 = vsyncadd [#allocation6], 4294967168  ;;  %v36_v0 = vld [vmem:[#allocation5] sm:$0xff]  ;;  %v37_v1 = vld [vmem:[#allocation2] sm:$0xff]  ;;  %vm39_vm0 = vcmask 261120   ;;  %s143_s4 = smov 32  }
  0x26   :  { %v38_v2 = vadd.f32 %v37_v1, %v36_v0  ;;  %43 = vrot.lane.b32.xlu0 %v36_v0, %s143_s4  ;;  %s144_s5 = smov [#allocation7]   ;;  %vm47_vm1 = vcmask 523520  }
  0x27   :  { %s55_s6 = sshll.u32 %s144_s5, 4  ;;  %s56_s6 = int_to_ptr.vmem [resolvable:$true] %s55_s6 }
  0x28   :  { %40 = vst.msk [vmem:[#allocation7] sm:$0xff] %vm39_vm0, %v38_v2  ;;  %s113_s7 = scalar_lea.vmem %s56_s6, 128  ;;  %p118_p3 = scmp.lt.s32.totalorder %s56_s6, %s56_s6 }
  0x29   :  { %p114_p2 = scmp.ne.s32.totalorder %s56_s6, %s113_s7  ;;  %p119_p4 = scmp.lt.s32.totalorder %s113_s7, %s113_s7 }
  0x2b   :  { %p120_p5 = por %p119_p4, %p118_p3 }
  0x2d   :  { %p121_p6 = pnand %p120_p5, %p114_p2 }
  0x98   :  { %v44_v3 = vpop.permute.xlu0 %43 }
  0x99   :  { %v46_v4 = vadd.f32 %v44_v3, %v37_v1 }
  0x9b   :  { %48 = vst.msk [vmem:[#allocation7] sm:$0xff] %vm47_vm1, %v46_v4 }
  0x9c   :  { %124 = shalt.err (!%p121_p6)
}
  0x9d   :  { %s125_s9 = scalar_lea.hbm %s198_s2, 128 }
  0x9e   :  { %p126_p7 = scmp.ne.s32.totalorder %s198_s2, %s125_s9  ;;  %p129_p8 = scmp.lt.u32.totalorder %s125_s9, %s198_s2 }
  0xa0   :  { %p131_p9 = pnand %p129_p8, %p126_p7 }
  0xa2   :  { %134 = shalt.err (!%p131_p9)
}
  0xa3   :  { %58 = dma.vmem_to_hbm [thread:$0]  %s56_s6, 128, %s198_s2, [#allocation4]  }
  0xa4   :  { %139 = dma.done.wait [#allocation4], 128  }
  0xa5   :  { %140 = vsyncadd [#allocation4], 4294967168 }
  0xa6   :  { %62 = vsyncpa [#allocation3], 1 }
  0xa7   :  { %63 = vsyncpa [#allocation6], 1 }
  0xa8   :  { %64 = vsyncpa [#allocation4], 1 }

</bundles_post_ra>
